<compile_context>
chip_gen: v7x
topology: tpu7x:2x2x1
jax: 0.10.0
libtpu: 0.0.40
codegen_flags: <defaults>
</compile_context>

<pallas_src>
import jax
import jax.numpy as jnp
from jax.experimental import pallas as pl
from jax.experimental.pallas import tpu as pltpu

KD, KH = 3, 3      # kernel (3, 3, 1): kw = 1 / pad 0 means W is a pure batch dim
LANE = 128         # TPU lane width; Cout is padded to a multiple of this
TM_DEFAULT = 512   # rows per tile (multiple of 8; big enough to near HBM roofline)
VMEM_LIMIT = 32 * 1024 * 1024  # safe on v5e/v6e/v7x; per-step footprint is far smaller


def conv_stats_kernel(p_ref, w_ref, y_ref, psum_ref, psq_ref):
    """patches-tile @ weight (bf16 in, f32 acc); emit y (bf16) + per-tile BN partial stats."""
    acc = jnp.dot(p_ref[...], w_ref[...], preferred_element_type=jnp.float32)
    y_ref[...] = acc.astype(y_ref.dtype)

    s = jnp.sum(acc, axis=0, keepdims=True)          # (1, Cp)
    q = jnp.sum(acc * acc, axis=0, keepdims=True)    # (1, Cp)
    # Write partials into row 0 of this tile's (8, Cp) block; other rows zero.
    row = jax.lax.broadcasted_iota(jnp.int32, psum_ref.shape, 0)
    psum_ref[...] = jnp.where(row == 0, s, 0.0)
    psq_ref[...] = jnp.where(row == 0, q, 0.0)


def bn_act_kernel(y_ref, scale_ref, shift_ref, o_ref):
    """Fused batch-norm affine (precomputed scale/shift) + ReLU."""
    y = y_ref[...].astype(jnp.float32)
    out = y * scale_ref[...] + shift_ref[...]        # broadcast (1, Cp)
    o_ref[...] = jnp.maximum(out, 0.0).astype(o_ref.dtype)   # activation = ReLU


def conv_3x3x1_forward(x_ncdhw, w, b, gamma, beta, eps=1e-5, tm=TM_DEFAULT):
    """x_ncdhw: (N, Cin, D, H, W) f32; w: (3,3,Cin,Cout); b/gamma/beta: (Cout,)."""
    del b  # conv bias cancels exactly under training-mode BN (mean subtraction)

    N, Cin, D, H, W = x_ncdhw.shape
    Cout = w.shape[-1]
    Cp = ((Cout + LANE - 1) // LANE) * LANE          # lane-dense channel dim
    K = KD * KH * Cin

    # ---- glue: NCDHW -> NDHWC, pad D/H, im2col (bf16) ----
    x = jnp.transpose(x_ncdhw, (0, 2, 3, 4, 1))                  # (N,D,H,W,Cin)
    xp = jnp.pad(x, ((0, 0), (1, 1), (1, 1), (0, 0), (0, 0)))    # zero pad D,H
    cols = [xp[:, kd:kd + D, kh:kh + H, :, :]
            for kd in range(KD) for kh in range(KH)]
    patches = jnp.concatenate(cols, axis=-1).reshape(-1, K).astype(jnp.bfloat16)

    M = N * D * H * W
    TM = tm
    grid_m = pl.cdiv(M, TM)
    Mp = grid_m * TM
    if Mp != M:
        # padded rows are all-zero -> zero conv output -> zero contribution to sums
        patches = jnp.pad(patches, ((0, Mp - M), (0, 0)))

    wmat = w.reshape(K, Cout).astype(jnp.bfloat16)
    wmat = jnp.pad(wmat, ((0, 0), (0, Cp - Cout)))               # (K, Cp)

    # ---- Pallas kernel 1: conv-as-matmul + per-tile BN statistics ----
    y, ps, pq = pl.pallas_call(
        conv_stats_kernel,
        out_shape=(
            jax.ShapeDtypeStruct((Mp, Cp), jnp.bfloat16),
            jax.ShapeDtypeStruct((grid_m * 8, Cp), jnp.float32),
            jax.ShapeDtypeStruct((grid_m * 8, Cp), jnp.float32),
        ),
        grid_spec=pltpu.PrefetchScalarGridSpec(
            num_scalar_prefetch=0,
            grid=(grid_m,),
            in_specs=[
                pl.BlockSpec((TM, K), lambda i: (i, 0)),
                pl.BlockSpec((K, Cp), lambda i: (0, 0)),
            ],
            out_specs=[
                pl.BlockSpec((TM, Cp), lambda i: (i, 0)),
                pl.BlockSpec((8, Cp), lambda i: (i, 0)),
                pl.BlockSpec((8, Cp), lambda i: (i, 0)),
            ],
        ),
        compiler_params=pltpu.CompilerParams(
            dimension_semantics=("parallel",),     # per-tile partials -> megacore OK
            vmem_limit_bytes=VMEM_LIMIT),
    )(patches, wmat)

    # ---- glue: reduce partials, fold into per-channel scale / shift ----
    count = jnp.float32(M)                           # true rows only
    s = jnp.sum(ps, axis=0)                          # (Cp,)
    q = jnp.sum(pq, axis=0)                          # (Cp,)
    mean = s / count
    var = jnp.maximum(q / count - mean * mean, 0.0)  # biased variance, clamped >= 0
    gamma_p = jnp.pad(gamma.astype(jnp.float32), (0, Cp - Cout))
    beta_p = jnp.pad(beta.astype(jnp.float32), (0, Cp - Cout))
    inv_std = jax.lax.rsqrt(var + eps)
    scale = (gamma_p * inv_std).reshape(1, Cp)
    shift = (beta_p - mean * gamma_p * inv_std).reshape(1, Cp)

    # ---- Pallas kernel 2: BN affine + ReLU (lane-dense, parallel tiles) ----
    out_p = pl.pallas_call(
        bn_act_kernel,
        out_shape=jax.ShapeDtypeStruct((Mp, Cp), jnp.float32),
        grid_spec=pltpu.PrefetchScalarGridSpec(
            num_scalar_prefetch=0,
            grid=(grid_m,),
            in_specs=[
                pl.BlockSpec((TM, Cp), lambda i: (i, 0)),
                pl.BlockSpec((1, Cp), lambda i: (0, 0)),
                pl.BlockSpec((1, Cp), lambda i: (0, 0)),
            ],
            out_specs=pl.BlockSpec((TM, Cp), lambda i: (i, 0)),
        ),
        compiler_params=pltpu.CompilerParams(
            dimension_semantics=("parallel",),
            vmem_limit_bytes=VMEM_LIMIT),
    )(y, scale, shift)

    out = out_p[:M, :Cout].reshape(N, D, H, W, Cout)
    return jnp.transpose(out, (0, 4, 1, 2, 3))       # back to NCDHW


def reference_forward(x_ncdhw, w, b, gamma, beta, eps=1e-5):
    """Pure-JAX reference (high precision, includes the conv bias) of the same forward."""
    N, Cin, D, H, W = x_ncdhw.shape
    x = jnp.transpose(x_ncdhw, (0, 2, 3, 4, 1))
    xp = jnp.pad(x, ((0, 0), (1, 1), (1, 1), (0, 0), (0, 0)))
    y = jnp.zeros((N, D, H, W, w.shape[-1]), jnp.float32)
    for kd in range(KD):
        for kh in range(KH):
            y = y + jnp.einsum('ndhwc,co->ndhwo',
                               xp[:, kd:kd + D, kh:kh + H, :, :], w[kd, kh],
                               precision=jax.lax.Precision.HIGHEST)
    y = y + b
    mean = y.mean(axis=(0, 1, 2, 3))
    var = y.var(axis=(0, 1, 2, 3))
    yn = gamma * (y - mean) * jax.lax.rsqrt(var + eps) + beta
    yn = jnp.maximum(yn, 0.0)
    return jnp.transpose(yn, (0, 4, 1, 2, 3))


if __name__ == "__main__":
    # Small shapes consistent with Conv3d NCDHW input; M = N*D*H*W = 960 is NOT a
    # multiple of TM=512, so the padded-remainder path is exercised too.
    N, Cin, Cout = 2, 4, 8
    D, H, W = 10, 12, 4

    key = jax.random.PRNGKey(0)
    kx, kw, kb = jax.random.split(key, 3)

    x = jax.random.normal(kx, (N, Cin, D, H, W), dtype=jnp.float32)
    fan_in = Cin * KD * KH
    w = jax.random.normal(kw, (KD, KH, Cin, Cout), dtype=jnp.float32) / jnp.sqrt(
        jnp.float32(fan_in))
    b = jax.random.normal(kb, (Cout,), dtype=jnp.float32) * 0.1
    gamma = jnp.ones((Cout,), jnp.float32)   # BN default init
    beta = jnp.zeros((Cout,), jnp.float32)

    out = conv_3x3x1_forward(x, w, b, gamma, beta)
    out = jax.block_until_ready(out)

    ref = reference_forward(x, w, b, gamma, beta)
    assert out.shape == (N, Cout, D, H, W), out.shape
    if not jnp.allclose(out, ref, rtol=5e-2, atol=5e-2):
        err = jnp.max(jnp.abs(out - ref))
        raise AssertionError(f"Pallas output does not match reference (max err {err})")

    print("KERNEL_OK")
</pallas_src>

<mosaic_0001>
module attributes {stable_mosaic.version = 11 : i64} {
  func.func @conv_stats_kernel(%arg0: i32, %arg1: memref<512x36xbf16, #tpu.memory_space<vmem>>, %arg2: memref<36x128xbf16, #tpu.memory_space<vmem>>, %arg3: memref<512x128xbf16, #tpu.memory_space<vmem>>, %arg4: memref<8x128xf32, #tpu.memory_space<vmem>>, %arg5: memref<8x128xf32, #tpu.memory_space<vmem>>) attributes {dimension_semantics = [#tpu.dimension_semantics<parallel>], iteration_bounds = array<i64: 2>, scalar_prefetch = 0 : i64, scratch_operands = 0 : i64, tpu.core_type = #tpu.core_type<tc>, window_params = [{transform_indices = @transform_0, window_bounds = array<i64: 512, 36>}, {pipeline_mode = #tpu.pipeline_mode<synchronous>, transform_indices = @transform_1, window_bounds = array<i64: 36, 128>}, {transform_indices = @transform_2, window_bounds = array<i64: 512, 128>}, {transform_indices = @transform_3, window_bounds = array<i64: 8, 128>}, {transform_indices = @transform_4, window_bounds = array<i64: 8, 128>}]} {
    %c0 = arith.constant 0 : index
    %c0_0 = arith.constant 0 : index
    %0 = vector.load %arg1[%c0, %c0_0] : memref<512x36xbf16, #tpu.memory_space<vmem>>, vector<512x36xbf16>
    %c0_1 = arith.constant 0 : index
    %c0_2 = arith.constant 0 : index
    %1 = vector.load %arg2[%c0_1, %c0_2] : memref<36x128xbf16, #tpu.memory_space<vmem>>, vector<36x128xbf16>
    %cst = arith.constant dense<0.000000e+00> : vector<512x128xf32>
    %2 = tpu.matmul %0, %1, %cst {dimension_numbers = #tpu.dot_dimension_numbers<[1], [0], [0], [1], [0, 0, 1, 1], [], []>} : vector<512x36xbf16>, vector<36x128xbf16>, vector<512x128xf32> -> vector<512x128xf32>
    %3 = arith.truncf %2 : vector<512x128xf32> to vector<512x128xbf16>
    %c0_3 = arith.constant 0 : index
    %c0_4 = arith.constant 0 : index
    %4 = vector.load %arg3[%c0_3, %c0_4] : memref<512x128xbf16, #tpu.memory_space<vmem>>, vector<512x128xbf16>
    tpu.vector_store %arg3[%c0_3, %c0_4], %3 {strides = array<i32>} : memref<512x128xbf16, #tpu.memory_space<vmem>>, vector<512x128xbf16>,
    %cst_5 = arith.constant dense<0.000000e+00> : vector<128xf32>
    %5 = vector.multi_reduction <add>, %2, %cst_5 [0] : vector<512x128xf32> to vector<128xf32>
    %6 = vector.shape_cast %5 : vector<128xf32> to vector<1x128xf32>
    %7 = arith.mulf %2, %2 : vector<512x128xf32>
    %cst_6 = arith.constant dense<0.000000e+00> : vector<128xf32>
    %8 = vector.multi_reduction <add>, %7, %cst_6 [0] : vector<512x128xf32> to vector<128xf32>
    %9 = vector.shape_cast %8 : vector<128xf32> to vector<1x128xf32>
    %10 = tpu.iota {dimensions = array<i32: 0>} : vector<8x128xi32>
    %c0_i32 = arith.constant 0 : i32
    %11 = vector.broadcast %c0_i32 : i32 to vector<8x128xi32>
    %12 = arith.cmpi eq, %10, %11 : vector<8x128xi32>
    %cst_7 = arith.constant 0.000000e+00 : f32
    %13 = vector.shape_cast %6 : vector<1x128xf32> to vector<1x128xf32>
    %14 = vector.broadcast %13 : vector<1x128xf32> to vector<8x128xf32>
    %15 = vector.broadcast %cst_7 : f32 to vector<8x128xf32>
    %16 = arith.select %12, %14, %15 : vector<8x128xi1>, vector<8x128xf32>
    %c0_8 = arith.constant 0 : index
    %c0_9 = arith.constant 0 : index
    %17 = vector.load %arg4[%c0_8, %c0_9] : memref<8x128xf32, #tpu.memory_space<vmem>>, vector<8x128xf32>
    tpu.vector_store %arg4[%c0_8, %c0_9], %16 {strides = array<i32>} : memref<8x128xf32, #tpu.memory_space<vmem>>, vector<8x128xf32>,
    %c0_i32_10 = arith.constant 0 : i32
    %18 = vector.broadcast %c0_i32_10 : i32 to vector<8x128xi32>
    %19 = arith.cmpi eq, %10, %18 : vector<8x128xi32>
    %cst_11 = arith.constant 0.000000e+00 : f32
    %20 = vector.shape_cast %9 : vector<1x128xf32> to vector<1x128xf32>
    %21 = vector.broadcast %20 : vector<1x128xf32> to vector<8x128xf32>
    %22 = vector.broadcast %cst_11 : f32 to vector<8x128xf32>
    %23 = arith.select %19, %21, %22 : vector<8x128xi1>, vector<8x128xf32>
    %c0_12 = arith.constant 0 : index
    %c0_13 = arith.constant 0 : index
    %24 = vector.load %arg5[%c0_12, %c0_13] : memref<8x128xf32, #tpu.memory_space<vmem>>, vector<8x128xf32>
    tpu.vector_store %arg5[%c0_12, %c0_13], %23 {strides = array<i32>} : memref<8x128xf32, #tpu.memory_space<vmem>>, vector<8x128xf32>,
    return
  }
  func.func @transform_0(%arg0: i32) -> (i32, i32) {
    %c0_i32 = arith.constant 0 : i32
    %c0_i32_0 = arith.constant 0 : i32
    return %arg0, %c0_i32 : i32, i32
  }
  func.func @transform_1(%arg0: i32) -> (i32, i32) {
    %c0_i32 = arith.constant 0 : i32
    %c0_i32_0 = arith.constant 0 : i32
    %c0_i32_1 = arith.constant 0 : i32
    return %c0_i32, %c0_i32_0 : i32, i32
  }
  func.func @transform_2(%arg0: i32) -> (i32, i32) {
    %c0_i32 = arith.constant 0 : i32
    %c0_i32_0 = arith.constant 0 : i32
    return %arg0, %c0_i32 : i32, i32
  }
  func.func @transform_3(%arg0: i32) -> (i32, i32) {
    %c0_i32 = arith.constant 0 : i32
    %c0_i32_0 = arith.constant 0 : i32
    return %arg0, %c0_i32 : i32, i32
  }
  func.func @transform_4(%arg0: i32) -> (i32, i32) {
    %c0_i32 = arith.constant 0 : i32
    %c0_i32_0 = arith.constant 0 : i32
    return %arg0, %c0_i32 : i32, i32
  }
}

</mosaic_0001>

<bundles_post_ra>
// kernel: tpu_custom_call.1
= control target key start
LH: loop header
LB: loop body
LE: loop exit
PB: predicated region body
PF: predicated region fallthrough
CT: control target
= control target key end

     0   :  { %10 = vsyncpa [#allocation3], 0  ;;  %s2790_s0 = inlined_call_operand.vmem [shape: bf16[1024,36], index: 0, kind: input, shape index: {}]   ;;  %s2791_s1 = inlined_call_operand.vmem [shape: bf16[36,128], index: 1, kind: input, shape index: {}]   ;;  %s2792_s2 = inlined_call_operand.hbm [shape: bf16[1024,128], index: 2, kind: output, shape index: {0}]   ;;  %s2793_s3 = inlined_call_operand.hbm [shape: f32[16,128], index: 3, kind: output, shape index: {1}]   ;;  %s2794_s4 = inlined_call_operand.hbm [shape: f32[16,128], index: 4, kind: output, shape index: {2}]  }
   0x1   :  { %12 = vsyncpa [#allocation3 + $0x1], 0 }
   0x2   :  { %13 = vsyncpa [#allocation5], 0 }
   0x3   :  { %15 = vsyncpa [#allocation5 + $0x1], 0  ;;  %s2312_s15 = smov 0   ;;  %s2314_s16 = smov 0  }
   0x4   :  { %s2316_s17 = smov 0   ;;  %s2318_s18 = smov 0  }
   0x5 LB: > { %s2333_s19 = sadd.s32 4294967295, %s2280_s18   ;;  %s1554_s20 = sadd.s32 4294967294, %s2280_s18   ;;  %s2280_s18 = sphi %s2318_s18, %s2800_s18   ;;  %s2276_s17 = sphi %s2316_s17, %s2799_s17   ;;  %s2272_s16 = sphi %s2314_s16, %s2798_s16   ;;  %s2268_s15 = sphi %s2312_s15, %s2797_s15  }
   0x6   : > { %s2337_s21 = sadd.s32 1, %s2280_s18   ;;  %s75_s22 = sadd.s32 1, %s2276_s17 }
   0x7   : > { %s72_s23 = ssub.s32 %s2280_s18, %s2337_s21  ;;  %p85_p0 = scmp.ne.s32.totalorder %s2276_s17, %s2272_s16 }
   0x8   : > { %p73_p1 = scmp.eq.s32.totalorder %s72_s23, 0  ;;  %p86_p2 = scmp.eq.s32.totalorder %s2333_s19, 1 }
   0x9   : > { %p91_p3 = scmp.ne.s32.totalorder %s2272_s16, %s2268_s15  ;;  %p92_p4 = scmp.eq.s32.totalorder %s1554_s20, 1 }
   0xa   : > { %s2350_s24 = scalar_select %p73_p1, %s2276_s17, %s75_s22  }
   0xb   : > { %p2352_p5 = por %p86_p2, %p85_p0  ;;  %p2356_p6 = por %p92_p4, %p91_p3 }
   0xc   : > { %p1557_p7 = scmp.ge.s32.totalorder %s2280_s18, 1  ;;  %p174_p8 = scmp.lt.s32.totalorder %s2280_s18, 3 }
   0xe   : > { %p175_p9 = pnand %p1557_p7, %p174_p8 }
   0xf   : > { %v2123_v0 = vld [vmem:[%s2791_s1] sm:$0xff] (!%p175_p9)   ;;  %v2124_v1 = vld [vmem:[%s2791_s1 + $0x8] sm:$0xff] (!%p175_p9)   ;;  %s1561_s5 = sshll.u32 (!%p175_p9), %s2333_s19, 6  ;;  %v2125_v2 = vld [vmem:[%s2791_s1 + $0x10] ss:$0 sps:$4 sm:$0x33] (!%p175_p9)  }
  0x10   : > { %178 = sbr.rel (%p175_p9) target bundleno = 430 (0x1ae), region = 28  ;;  %1994 = vmatprep.subr.bf16.mxu0 (!%p175_p9), %v2123_v0  ;;  %p211_p10 = scmp.lt.s32.totalorder (!%p175_p9), %s1561_s5, 127  ;;  %2064 = vmatprep.subr.bf16.mxu1 (!%p175_p9), %v2123_v0  ;;  %vm559_vm0 = vcmask (!%p175_p9), 1041408   ;;  %vm462_vm1 = vcmask (!%p175_p9), 293888  }
  0x11   : > { %1995 = vmatpush3.bf16.msra.mxu0 (!%p175_p9), %v2123_v0  ;;  %2067 = vmatpush3.bf16.msra.mxu1 (!%p175_p9), %v2123_v0  ;;  %v561_v3 = vsel (!%p175_p9), %vm559_vm0, %v2125_v2, 0  ;;  %s2442_s12 = sand.u32 (!%p175_p9), 1, %s2272_s16   ;;  %s1767_s22 = sshll.u32 (!%p175_p9), %s2333_s19, 12 }
  0x12   : > { %1996 = vmatprep.subr.bf16.mxu0 (!%p175_p9), %v2124_v1  ;;  %2065 = vmatprep.subr.bf16.mxu1 (!%p175_p9), %v2124_v1  ;;  %s1558_s13 = sshll.u32 (!%p175_p9), %s2442_s12, 8  ;;  %s2590_s29 = scalar_lea.hbm (!%p175_p9), %s2792_s2, %s1767_s22 }
  0x13   : > { %s2445_s14 = scalar_lea.vmem (!%p175_p9), [#allocation2], %s1558_s13  ;;  %s1382_s30 = scalar_lea.sflag (!%p175_p9), [#allocation3], %s2442_s12 }
  0x14   : > { %s1405_s23 = sshll.u32 (!%p175_p9), %s2445_s14, 4  ;;  %s2282_s6 = smov (!%p175_p9), [#allocation2]   ;;  %s2592_s23 = int_to_ptr.vmem [resolvable:$true] %s1405_s23 }
  0x15   : > { %1997 = vmatpush3.bf16.msra.mxu0 (!%p175_p9), %v2124_v1  ;;  %2068 = vmatpush3.bf16.msra.mxu1 (!%p175_p9), %v2124_v1  ;;  %s2162_s7 = sshll.u32 (!%p175_p9), %s2282_s6, 4  ;;  %s2163_s7 = int_to_ptr.vmem [resolvable:$false] %s2162_s7 }
  0x16   : > { %2070 = vmatprep.subr.msk.bf16.mxu0 (!%p175_p9), %vm559_vm0, %v2125_v2  ;;  %2071 = vmatprep.subr.msk.bf16.mxu1 (!%p175_p9), %vm559_vm0, %v2125_v2  ;;  %p2165_p0 = scmp.lt.s32.totalorder (!%p175_p9), %s2592_s23, %s2163_s7 }
  0x17   : > { %s2802_s5 = smov (!%p211_p10, %s1561_s5), 127 }
  0x18   : > { %s1562_s8 = sshll.u32 %s2802_s5, 2  ;;  %s2158_s5 = scalar_lea.vmem %s2592_s23, 4096 }
  0x19   : > { %s2375_s11 = scalar_lea.vmem %s2790_s0, %s1562_s8  ;;  %1999 = vmatpush3.bf16.msra.mxu0 %v561_v3  ;;  %2069 = vmatpush3.bf16.msra.mxu1 %v561_v3  ;;  %p2159_p11 = scmp.ne.s32.totalorder %s2592_s23, %s2158_s5 }
  0x1a   : > { %v2126_v4 = vld [vmem:[%s2375_s11] sm:$0xff]   ;;  %v2127_v5 = vld [vmem:[%s2375_s11 + $0x8] sm:$0xff]   ;;  %v2128_v6 = vld [vmem:[%s2375_s11 + $0x10] sm:$0xff]   ;;  %s2164_s8 = scalar_lea.vmem %s2163_s7, 8192 }
  0x1b   : > { %2000 = vmatprep.mubr.msk.bf16.mxu0 %vm462_vm1, %v2126_v4  ;;  %v2129_v7 = vld [vmem:[%s2375_s11 + $0x18] sm:$0xff]   ;;  %v2130_v8 = vld [vmem:[%s2375_s11 + $0x20] sm:$0xff]   ;;  %v2131_v9 = vld [vmem:[%s2375_s11 + $0x28] sm:$0xff]   ;;  %p2160_p12 = pnand %p2159_p11, %p2352_p5  ;;  %p2166_p1 = scmp.lt.s32.totalorder %s2164_s8, %s2158_s5 }
  0x1c   : > { %2001 = vmatmul.mubr.msk.bf16.vlgmr.msra.gmra.mrb[0].mxu0 %vm462_vm1, %v2127_v5  ;;  %v2142_v10 = vld [vmem:[%s2375_s11 + $0x80] sm:$0xff]   ;;  %v2143_v11 = vld [vmem:[%s2375_s11 + $0x88] sm:$0xff]   ;;  %v2144_v12 = vld [vmem:[%s2375_s11 + $0x90] sm:$0xff]  }
  0x1d   : > { %2004 = vmatprep.mubr.msk.bf16.mxu0 %vm462_vm1, %v2128_v6  ;;  %2032 = vmatprep.mubr.msk.bf16.mxu1 %vm462_vm1, %v2142_v10  ;;  %v2132_v13 = vld [vmem:[%s2375_s11 + $0x30] sm:$0xff]   ;;  %v2145_v14 = vld [vmem:[%s2375_s11 + $0x98] sm:$0xff]   ;;  %v2146_v15 = vld [vmem:[%s2375_s11 + $0xa0] sm:$0xff]   ;;  %p2161_p13 = pneg %p2160_p12  ;;  %p2167_p2 = por %p2166_p1, %p2165_p0 }
  0x1e   : > { %2033 = vmatmul.mubr.msk.bf16.vlgmr.msra.gmra.mrb[0].mxu1 %vm462_vm1, %v2143_v11  ;;  %v2133_v16 = vld [vmem:[%s2375_s11 + $0x38] sm:$0xff]   ;;  %v2134_v17 = vld [vmem:[%s2375_s11 + $0x40] sm:$0xff]   ;;  %v2147_v18 = vld [vmem:[%s2375_s11 + $0xa8] sm:$0xff]  }
  0x1f   : > { %2036 = vmatprep.mubr.msk.bf16.mxu1 %vm462_vm1, %v2144_v12  ;;  %v2148_v19 = vld [vmem:[%s2375_s11 + $0xb0] sm:$0xff]   ;;  %v2135_v20 = vld [vmem:[%s2375_s11 + $0x48] sm:$0xff]   ;;  %v2149_v22 = vld [vmem:[%s2375_s11 + $0xb8] sm:$0xff]   ;;  %p2168_p3 = pnand %p2167_p2, %p2161_p13 }
  0x20   : > { %v2136_v21 = vld [vmem:[%s2375_s11 + $0x50] sm:$0xff]   ;;  %v2150_v23 = vld [vmem:[%s2375_s11 + $0xc0] sm:$0xff]   ;;  %v2137_v24 = vld [vmem:[%s2375_s11 + $0x58] sm:$0xff]  }
  0x21   : > { %v2138_v25 = vld [vmem:[%s2375_s11 + $0x60] sm:$0xff]   ;;  %v2151_v26 = vld [vmem:[%s2375_s11 + $0xc8] sm:$0xff]   ;;  %v2152_v27 = vld [vmem:[%s2375_s11 + $0xd0] sm:$0xff]  }
  0x22   : > { %v2139_v28 = vld [vmem:[%s2375_s11 + $0x68] sm:$0xff]   ;;  %v2140_v29 = vld [vmem:[%s2375_s11 + $0x70] sm:$0xff]   ;;  %v2153_v30 = vld [vmem:[%s2375_s11 + $0xd8] sm:$0xff]  }
  0x23   : > { %v2154_v31 = vld [vmem:[%s2375_s11 + $0xe0] sm:$0xff]   ;;  %v2141_v32 = vld [vmem:[%s2375_s11 + $0x78] sm:$0xff]   ;;  %v2155_v33 = vld [vmem:[%s2375_s11 + $0xe8] sm:$0xff]  }
  0x24   : > { %2005 = vmatmul.mubr.msk.bf16.gmra.mrb[4].mxu0 %vm462_vm1, %v2129_v7  ;;  %v2156_v34 = vld [vmem:[%s2375_s11 + $0xf0] sm:$0xff]   ;;  %v2157_v35 = vld [vmem:[%s2375_s11 + $0xf8] sm:$0xff]  }
  0x25   : > { %2008 = vmatprep.mubr.msk.bf16.mxu0 %vm462_vm1, %v2130_v8 }
  0x26   : > { %2037 = vmatmul.mubr.msk.bf16.gmra.mrb[4].mxu1 %vm462_vm1, %v2145_v14 }
  0x27   : > { %2040 = vmatprep.mubr.msk.bf16.mxu1 %vm462_vm1, %v2146_v15 }
  0x2c   : > { %2009 = vmatmul.mubr.msk.bf16.gmra.mrb[8].mxu0 %vm462_vm1, %v2131_v9 }
  0x2d   : > { %2012 = vmatprep.mubr.msk.bf16.mxu0 %vm462_vm1, %v2132_v13 }
  0x2e   : > { %2041 = vmatmul.mubr.msk.bf16.gmra.mrb[8].mxu1 %vm462_vm1, %v2147_v18 }
  0x2f   : > { %2044 = vmatprep.mubr.msk.bf16.mxu1 %vm462_vm1, %v2148_v19 }
  0x34   : > { %2013 = vmatmul.mubr.msk.bf16.gmra.mrb[12].mxu0 %vm462_vm1, %v2133_v16 }
  0x35   : > { %2016 = vmatprep.mubr.msk.bf16.mxu0 %vm462_vm1, %v2134_v17 }
  0x36   : > { %2045 = vmatmul.mubr.msk.bf16.gmra.mrb[12].mxu1 %vm462_vm1, %v2149_v22 }
  0x37   : > { %2048 = vmatprep.mubr.msk.bf16.mxu1 %vm462_vm1, %v2150_v23 }
  0x3c   : > { %2017 = vmatmul.mubr.msk.bf16.gmra.mrb[16].mxu0 %vm462_vm1, %v2135_v20 }
  0x3d   : > { %2020 = vmatprep.mubr.msk.bf16.mxu0 %vm462_vm1, %v2136_v21 }
  0x3e   : > { %2049 = vmatmul.mubr.msk.bf16.gmra.mrb[16].mxu1 %vm462_vm1, %v2151_v26 }
  0x3f   : > { %2052 = vmatprep.mubr.msk.bf16.mxu1 %vm462_vm1, %v2152_v27 }
  0x44   : > { %2021 = vmatmul.mubr.msk.bf16.gmra.mrb[20].mxu0 %vm462_vm1, %v2137_v24 }
  0x45   : > { %2024 = vmatprep.mubr.msk.bf16.mxu0 %vm462_vm1, %v2138_v25 }
  0x46   : > { %2053 = vmatmul.mubr.msk.bf16.gmra.mrb[20].mxu1 %vm462_vm1, %v2153_v30 }
  0x47   : > { %2056 = vmatprep.mubr.msk.bf16.mxu1 %vm462_vm1, %v2154_v31 }
  0x4c   : > { %2025 = vmatmul.mubr.msk.bf16.gmra.mrb[24].mxu0 %vm462_vm1, %v2139_v28 }
  0x4d   : > { %2028 = vmatprep.mubr.msk.bf16.mxu0 %vm462_vm1, %v2140_v29 }
  0x4e   : > { %2057 = vmatmul.mubr.msk.bf16.gmra.mrb[24].mxu1 %vm462_vm1, %v2155_v33 }
  0x4f   : > { %2060 = vmatprep.mubr.msk.bf16.mxu1 %vm462_vm1, %v2156_v34 }
  0x54   : > { %2029 = vmatmul.mubr.msk.bf16.gmra.mrb[28].mxu0 %vm462_vm1, %v2141_v32 }
  0x56   : > { %2061 = vmatmul.mubr.msk.bf16.gmra.mrb[28].mxu1 %vm462_vm1, %v2157_v35 }
  0xef   : > { %v2002_v36 = vpop.f32.mrb[0].mxu0 }
  0xf0   : > { %v597_v37 = vpop.f32.mrb[1].mxu0  ;;  %v1243_v45 = vmul.f32 %v2002_v36, %v2002_v36 }
  0xf1   : > { %v2003_v38 = vpop.f32.mrb[2].mxu0  ;;  %v1241_v41 = vmul.f32 %v597_v37, %v597_v37  ;;  %v2450_v63 = vpop.f32.mrb[0].mxu1 }
  0xf2   : > { %v1776_v39 = vpack.c.bf16 %v2003_v38, %v2002_v36  ;;  %v600_v40 = vpop.f32.mrb[3].mxu0  ;;  %v1244_v48 = vmul.f32 %v2003_v38, %v2003_v38  ;;  %v2453_v3 = vpop.f32.mrb[1].mxu1 }
  0xf3   : > { %v1771_v42 = vpack.c.bf16 %v600_v40, %v597_v37  ;;  %v1172_v43 = vadd.f32 %v600_v40, %v597_v37  ;;  %v1242_v44 = vmul.f32 %v600_v40, %v600_v40  ;;  %v2455_v4 = vpop.f32.mrb[2].mxu1 }
  0xf4   : > { %1928 = vst [vmem:[%s2445_s14 + $0x8] sm:$0xff] %v1776_v39   ;;  %v1856_v9 = vpack.c.bf16 %v2455_v4, %v2450_v63  ;;  %v2459_v10 = vpop.f32.mrb[3].mxu1 }
  0xf5   : > { %1772 = vst [vmem:[%s2445_s14] sm:$0xff] %v1771_v42   ;;  %v1173_v46 = vadd.f32 %v2002_v36, %v1172_v43  ;;  %v1305_v47 = vadd.f32 %v1242_v44, %v1241_v41  ;;  %v1851_v12 = vpack.c.bf16 %v2459_v10, %v2453_v3 }
  0xf6   : > { %1944 = vst [vmem:[%s2445_s14 + $0x88] sm:$0xff] %v1856_v9  }
  0xf7   : > { %v1306_v49 = vadd.f32 %v1305_v47, %v1243_v45  ;;  %v2006_v50 = vpop.f32.mrb[4].mxu0  ;;  %v1174_v51 = vadd.f32 %v2003_v38, %v1173_v46  ;;  %1943 = vst [vmem:[%s2445_s14 + $0x80] sm:$0xff] %v1851_v12  }
  0xf8   : > { %v613_v52 = vpop.f32.mrb[5].mxu0  ;;  %v1247_v0 = vmul.f32 %v2006_v50, %v2006_v50 }
  0xf9   : > { %v1175_v53 = vadd.f32 %v1174_v51, %v613_v52  ;;  %v1245_v54 = vmul.f32 %v613_v52, %v613_v52  ;;  %v1307_v55 = vadd.f32 %v1306_v49, %v1244_v48  ;;  %v2007_v56 = vpop.f32.mrb[6].mxu0  ;;  %v2466_v23 = vpop.f32.mrb[4].mxu1 }
  0xfa   : > { %v1786_v57 = vpack.c.bf16 %v2007_v56, %v2006_v50  ;;  %v616_v58 = vpop.f32.mrb[7].mxu0  ;;  %v1248_v5 = vmul.f32 %v2007_v56, %v2007_v56  ;;  %v2469_v27 = vpop.f32.mrb[5].mxu1 }
  0xfb   : > { %v1308_v59 = vadd.f32 %v1307_v55, %v1245_v54  ;;  %v1781_v60 = vpack.c.bf16 %v616_v58, %v613_v52  ;;  %v1176_v61 = vadd.f32 %v1175_v53, %v616_v58  ;;  %v1246_v62 = vmul.f32 %v616_v58, %v616_v58  ;;  %v2471_v28 = vpop.f32.mrb[6].mxu1 }
  0xfc   : > { %1930 = vst [vmem:[%s2445_s14 + $0x18] sm:$0xff] %v1786_v57   ;;  %v1866_v33 = vpack.c.bf16 %v2471_v28, %v2466_v23  ;;  %v2475_v34 = vpop.f32.mrb[7].mxu1 }
  0xfd   : > { %1929 = vst [vmem:[%s2445_s14 + $0x10] sm:$0xff] %v1781_v60   ;;  %v1177_v1 = vadd.f32 %v2006_v50, %v1176_v61  ;;  %v1309_v2 = vadd.f32 %v1308_v59, %v1246_v62  ;;  %v1861_v36 = vpack.c.bf16 %v2475_v34, %v2469_v27 }
  0xfe   : > { %1946 = vst [vmem:[%s2445_s14 + $0x98] sm:$0xff] %v1866_v33  }
  0xff   : > { %v1310_v6 = vadd.f32 %v1309_v2, %v1247_v0  ;;  %v2010_v7 = vpop.f32.mrb[8].mxu0  ;;  %v1178_v8 = vadd.f32 %v2007_v56, %v1177_v1  ;;  %1945 = vst [vmem:[%s2445_s14 + $0x90] sm:$0xff] %v1861_v36  }
 0x100   : > { %v629_v11 = vpop.f32.mrb[9].mxu0  ;;  %v1251_v24 = vmul.f32 %v2010_v7, %v2010_v7 }
 0x101   : > { %v1179_v13 = vadd.f32 %v1178_v8, %v629_v11  ;;  %v1249_v14 = vmul.f32 %v629_v11, %v629_v11  ;;  %v1311_v15 = vadd.f32 %v1310_v6, %v1248_v5  ;;  %v2011_v16 = vpop.f32.mrb[10].mxu0  ;;  %v2482_v47 = vpop.f32.mrb[8].mxu1 }
 0x102   : > { %v1796_v17 = vpack.c.bf16 %v2011_v16, %v2010_v7  ;;  %v632_v18 = vpop.f32.mrb[11].mxu0  ;;  %v1252_v29 = vmul.f32 %v2011_v16, %v2011_v16  ;;  %v2485_v51 = vpop.f32.mrb[9].mxu1 }
 0x103   : > { %v1312_v19 = vadd.f32 %v1311_v15, %v1249_v14  ;;  %v1791_v20 = vpack.c.bf16 %v632_v18, %v629_v11  ;;  %v1180_v21 = vadd.f32 %v1179_v13, %v632_v18  ;;  %v1250_v22 = vmul.f32 %v632_v18, %v632_v18  ;;  %v2487_v52 = vpop.f32.mrb[10].mxu1 }
 0x104   : > { %1932 = vst [vmem:[%s2445_s14 + $0x28] sm:$0xff] %v1796_v17   ;;  %v1876_v57 = vpack.c.bf16 %v2487_v52, %v2482_v47  ;;  %v2491_v58 = vpop.f32.mrb[11].mxu1 }
 0x105   : > { %1931 = vst [vmem:[%s2445_s14 + $0x20] sm:$0xff] %v1791_v20   ;;  %v1181_v25 = vadd.f32 %v2010_v7, %v1180_v21  ;;  %v1313_v26 = vadd.f32 %v1312_v19, %v1250_v22  ;;  %v1871_v60 = vpack.c.bf16 %v2491_v58, %v2485_v51 }
 0x106   : > { %1948 = vst [vmem:[%s2445_s14 + $0xa8] sm:$0xff] %v1876_v57  }
 0x107   : > { %v1314_v30 = vadd.f32 %v1313_v26, %v1251_v24  ;;  %v2014_v31 = vpop.f32.mrb[12].mxu0  ;;  %v1182_v32 = vadd.f32 %v2011_v16, %v1181_v25  ;;  %1947 = vst [vmem:[%s2445_s14 + $0xa0] sm:$0xff] %v1871_v60  }
 0x108   : > { %v645_v35 = vpop.f32.mrb[13].mxu0  ;;  %v1255_v48 = vmul.f32 %v2014_v31, %v2014_v31 }
 0x109   : > { %v1183_v37 = vadd.f32 %v1182_v32, %v645_v35  ;;  %v1253_v38 = vmul.f32 %v645_v35, %v645_v35  ;;  %v1315_v39 = vadd.f32 %v1314_v30, %v1252_v29  ;;  %v2015_v40 = vpop.f32.mrb[14].mxu0  ;;  %v2498_v11 = vpop.f32.mrb[12].mxu1 }
 0x10a   : > { %v1806_v41 = vpack.c.bf16 %v2015_v40, %v2014_v31  ;;  %v648_v42 = vpop.f32.mrb[15].mxu0  ;;  %v1256_v53 = vmul.f32 %v2015_v40, %v2015_v40  ;;  %v2501_v15 = vpop.f32.mrb[13].mxu1 }
 0x10b   : > { %v1316_v43 = vadd.f32 %v1315_v39, %v1253_v38  ;;  %v1801_v44 = vpack.c.bf16 %v648_v42, %v645_v35  ;;  %v1184_v45 = vadd.f32 %v1183_v37, %v648_v42  ;;  %v1254_v46 = vmul.f32 %v648_v42, %v648_v42  ;;  %v2503_v16 = vpop.f32.mrb[14].mxu1 }
 0x10c   : > { %1934 = vst [vmem:[%s2445_s14 + $0x38] sm:$0xff] %v1806_v41   ;;  %v1886_v21 = vpack.c.bf16 %v2503_v16, %v2498_v11  ;;  %v2507_v22 = vpop.f32.mrb[15].mxu1 }
 0x10d   : > { %1933 = vst [vmem:[%s2445_s14 + $0x30] sm:$0xff] %v1801_v44   ;;  %v1185_v49 = vadd.f32 %v2014_v31, %v1184_v45  ;;  %v1317_v50 = vadd.f32 %v1316_v43, %v1254_v46  ;;  %v1881_v25 = vpack.c.bf16 %v2507_v22, %v2501_v15 }
 0x10e   : > { %1950 = vst [vmem:[%s2445_s14 + $0xb8] sm:$0xff] %v1886_v21  }
 0x10f   : > { %v1318_v54 = vadd.f32 %v1317_v50, %v1255_v48  ;;  %v2018_v55 = vpop.f32.mrb[16].mxu0  ;;  %v1186_v56 = vadd.f32 %v2015_v40, %v1185_v49  ;;  %1949 = vst [vmem:[%s2445_s14 + $0xb0] sm:$0xff] %v1881_v25  }
 0x110   : > { %v661_v59 = vpop.f32.mrb[17].mxu0  ;;  %v1259_v12 = vmul.f32 %v2018_v55, %v2018_v55 }
 0x111   : > { %v1187_v61 = vadd.f32 %v1186_v56, %v661_v59  ;;  %v1257_v62 = vmul.f32 %v661_v59, %v661_v59  ;;  %v1319_v0 = vadd.f32 %v1318_v54, %v1256_v53  ;;  %v2019_v1 = vpop.f32.mrb[18].mxu0  ;;  %v2514_v39 = vpop.f32.mrb[16].mxu1 }
 0x112   : > { %v1816_v2 = vpack.c.bf16 %v2019_v1, %v2018_v55  ;;  %v664_v5 = vpop.f32.mrb[19].mxu0  ;;  %v1260_v17 = vmul.f32 %v2019_v1, %v2019_v1  ;;  %v2517_v43 = vpop.f32.mrb[17].mxu1 }
 0x113   : > { %v1320_v6 = vadd.f32 %v1319_v0, %v1257_v62  ;;  %v1811_v7 = vpack.c.bf16 %v664_v5, %v661_v59  ;;  %v1188_v8 = vadd.f32 %v1187_v61, %v664_v5  ;;  %v1258_v9 = vmul.f32 %v664_v5, %v664_v5  ;;  %v2519_v44 = vpop.f32.mrb[18].mxu1 }
 0x114   : > { %1936 = vst [vmem:[%s2445_s14 + $0x48] sm:$0xff] %v1816_v2   ;;  %v1896_v50 = vpack.c.bf16 %v2519_v44, %v2514_v39  ;;  %v2523_v53 = vpop.f32.mrb[19].mxu1 }
 0x115   : > { %1935 = vst [vmem:[%s2445_s14 + $0x40] sm:$0xff] %v1811_v7   ;;  %v1189_v13 = vadd.f32 %v2018_v55, %v1188_v8  ;;  %v1321_v14 = vadd.f32 %v1320_v6, %v1258_v9  ;;  %v1891_v55 = vpack.c.bf16 %v2523_v53, %v2517_v43 }
 0x116   : > { %1952 = vst [vmem:[%s2445_s14 + $0xc8] sm:$0xff] %v1896_v50  }
 0x117   : > { %v1322_v18 = vadd.f32 %v1321_v14, %v1259_v12  ;;  %v2022_v19 = vpop.f32.mrb[20].mxu0  ;;  %v1190_v20 = vadd.f32 %v2019_v1, %v1189_v13  ;;  %1951 = vst [vmem:[%s2445_s14 + $0xc0] sm:$0xff] %v1891_v55  }
 0x118   : > { %v677_v24 = vpop.f32.mrb[21].mxu0  ;;  %v1263_v40 = vmul.f32 %v2022_v19, %v2022_v19 }
 0x119   : > { %v1191_v26 = vadd.f32 %v1190_v20, %v677_v24  ;;  %v1261_v29 = vmul.f32 %v677_v24, %v677_v24  ;;  %v1323_v30 = vadd.f32 %v1322_v18, %v1260_v17  ;;  %v2023_v31 = vpop.f32.mrb[22].mxu0  ;;  %v2530_v6 = vpop.f32.mrb[20].mxu1 }
 0x11a   : > { %v1826_v32 = vpack.c.bf16 %v2023_v31, %v2022_v19  ;;  %v680_v33 = vpop.f32.mrb[23].mxu0  ;;  %v1264_v45 = vmul.f32 %v2023_v31, %v2023_v31  ;;  %v2533_v12 = vpop.f32.mrb[21].mxu1 }
 0x11b   : > { %v1324_v35 = vadd.f32 %v1323_v30, %v1261_v29  ;;  %v1821_v36 = vpack.c.bf16 %v680_v33, %v677_v24  ;;  %v1192_v37 = vadd.f32 %v1191_v26, %v680_v33  ;;  %v1262_v38 = vmul.f32 %v680_v33, %v680_v33  ;;  %v2535_v13 = vpop.f32.mrb[22].mxu1 }
 0x11c   : > { %1938 = vst [vmem:[%s2445_s14 + $0x58] sm:$0xff] %v1826_v32   ;;  %v1906_v20 = vpack.c.bf16 %v2535_v13, %v2530_v6  ;;  %v2539_v21 = vpop.f32.mrb[23].mxu1 }
 0x11d   : > { %1937 = vst [vmem:[%s2445_s14 + $0x50] sm:$0xff] %v1821_v36   ;;  %v1193_v41 = vadd.f32 %v2022_v19, %v1192_v37  ;;  %v1325_v42 = vadd.f32 %v1324_v35, %v1262_v38  ;;  %v1901_v25 = vpack.c.bf16 %v2539_v21, %v2533_v12 }
 0x11e   : > { %1954 = vst [vmem:[%s2445_s14 + $0xd8] sm:$0xff] %v1906_v20  }
 0x11f   : > { %v1326_v46 = vadd.f32 %v1325_v42, %v1263_v40  ;;  %v2026_v48 = vpop.f32.mrb[24].mxu0  ;;  %v1194_v49 = vadd.f32 %v2023_v31, %v1193_v41  ;;  %1953 = vst [vmem:[%s2445_s14 + $0xd0] sm:$0xff] %v1901_v25  }
 0x120   : > { %v693_v54 = vpop.f32.mrb[25].mxu0  ;;  %v1267_v7 = vmul.f32 %v2026_v48, %v2026_v48 }
 0x121   : > { %v1195_v56 = vadd.f32 %v1194_v49, %v693_v54  ;;  %v1265_v57 = vmul.f32 %v693_v54, %v693_v54  ;;  %v1327_v59 = vadd.f32 %v1326_v46, %v1264_v45  ;;  %v2027_v60 = vpop.f32.mrb[26].mxu0  ;;  %v2546_v40 = vpop.f32.mrb[24].mxu1 }
 0x122   : > { %v1836_v61 = vpack.c.bf16 %v2027_v60, %v2026_v48  ;;  %v696_v62 = vpop.f32.mrb[27].mxu0  ;;  %v1268_v14 = vmul.f32 %v2027_v60, %v2027_v60  ;;  %v2549_v46 = vpop.f32.mrb[25].mxu1 }
 0x123   : > { %v1328_v0 = vadd.f32 %v1327_v59, %v1265_v57  ;;  %v1831_v1 = vpack.c.bf16 %v696_v62, %v693_v54  ;;  %v1196_v2 = vadd.f32 %v1195_v56, %v696_v62  ;;  %v1266_v5 = vmul.f32 %v696_v62, %v696_v62  ;;  %v2553_v49 = vpop.f32.mrb[26].mxu1 }
 0x124   : > { %1940 = vst [vmem:[%s2445_s14 + $0x68] sm:$0xff] %v1836_v61   ;;  %v1916_v56 = vpack.c.bf16 %v2553_v49, %v2546_v40  ;;  %v2557_v57 = vpop.f32.mrb[27].mxu1 }
 0x125   : > { %1939 = vst [vmem:[%s2445_s14 + $0x60] sm:$0xff] %v1831_v1   ;;  %v1197_v8 = vadd.f32 %v2026_v48, %v1196_v2  ;;  %v1329_v9 = vadd.f32 %v1328_v0, %v1266_v5  ;;  %v1273_v48 = vmul.f32 %v2453_v3, %v2453_v3  ;;  %v1911_v59 = vpack.c.bf16 %v2557_v57, %v2549_v46 }
 0x126   : > { %1956 = vst [vmem:[%s2445_s14 + $0xe8] sm:$0xff] %v1916_v56   ;;  %v1274_v1 = vmul.f32 %v2459_v10, %v2459_v10  ;;  %v1275_v5 = vmul.f32 %v2450_v63, %v2450_v63 }
 0x127   : > { %v1330_v17 = vadd.f32 %v1329_v9, %v1267_v7  ;;  %v2030_v18 = vpop.f32.mrb[28].mxu0  ;;  %v1198_v19 = vadd.f32 %v2027_v60, %v1197_v8  ;;  %1955 = vst [vmem:[%s2445_s14 + $0xe0] sm:$0xff] %v1911_v59   ;;  %v1276_v9 = vmul.f32 %v2455_v4, %v2455_v4 }
 0x128   : > { %v709_v24 = vpop.f32.mrb[29].mxu0  ;;  %v1271_v41 = vmul.f32 %v2030_v18, %v2030_v18 }
 0x129   : > { %v1199_v26 = vadd.f32 %v1198_v19, %v709_v24  ;;  %v1269_v29 = vmul.f32 %v709_v24, %v709_v24  ;;  %v1331_v30 = vadd.f32 %v1330_v17, %v1268_v14  ;;  %v2031_v31 = vpop.f32.mrb[30].mxu0  ;;  %v2567_v2 = vpop.f32.mrb[28].mxu1 }
 0x12a   : > { %v1846_v32 = vpack.c.bf16 %v2031_v31, %v2030_v18  ;;  %v712_v33 = vpop.f32.mrb[31].mxu0  ;;  %v1272_v50 = vmul.f32 %v2031_v31, %v2031_v31  ;;  %v2574_v8 = vpop.f32.mrb[29].mxu1 }
 0x12b   : > { %v1332_v35 = vadd.f32 %v1331_v30, %v1269_v29  ;;  %v1841_v36 = vpack.c.bf16 %v712_v33, %v709_v24  ;;  %v1200_v37 = vadd.f32 %v1199_v26, %v712_v33  ;;  %v1270_v38 = vmul.f32 %v712_v33, %v712_v33  ;;  %v2578_v14 = vpop.f32.mrb[30].mxu1 }
 0x12c   : > { %1942 = vst [vmem:[%s2445_s14 + $0x78] sm:$0xff] %v1846_v32   ;;  %v2585_v19 = vpop.f32.mrb[31].mxu1  ;;  %v1278_v29 = vmul.f32 %v2475_v34, %v2475_v34 }
 0x12d   : > { %1941 = vst [vmem:[%s2445_s14 + $0x70] sm:$0xff] %v1841_v36   ;;  %v1201_v42 = vadd.f32 %v2030_v18, %v1200_v37  ;;  %v1333_v45 = vadd.f32 %v1332_v35, %v1270_v38  ;;  %v1277_v18 = vmul.f32 %v2469_v27, %v2469_v27 }
 0x12f   : > { %v1334_v54 = vadd.f32 %v1333_v45, %v1271_v41  ;;  %v1202_v55 = vadd.f32 %v2031_v31, %v1201_v42 }
 0x131   : > { %v1203_v60 = vadd.f32 %v1202_v55, %v2453_v3  ;;  %v1335_v61 = vadd.f32 %v1334_v54, %v1272_v50 }
 0x133   : > { %v1336_v62 = vadd.f32 %v1335_v61, %v1273_v48  ;;  %v1204_v0 = vadd.f32 %v1203_v60, %v2459_v10 }
 0x135   : > { %v1205_v7 = vadd.f32 %v2450_v63, %v1204_v0  ;;  %v1337_v3 = vadd.f32 %v1336_v62, %v1274_v1  ;;  %v1926_v63 = vpack.c.bf16 %v2578_v14, %v2567_v2 }
 0x137   : > { %v1338_v10 = vadd.f32 %v1337_v3, %v1275_v5  ;;  %v1206_v17 = vadd.f32 %v2455_v4, %v1205_v7  ;;  %v1921_v4 = vpack.c.bf16 %v2585_v19, %v2574_v8  ;;  %1958 = vst [vmem:[%s2445_s14 + $0xf8] sm:$0xff] %v1926_v63  }
 0x139   : > { %v1207_v20 = vadd.f32 %v1206_v17, %v2469_v27  ;;  %v1339_v24 = vadd.f32 %v1338_v10, %v1276_v9  ;;  %1957 = vst [vmem:[%s2445_s14 + $0xf0] sm:$0xff] %v1921_v4  }
 0x13b   : > { %v1340_v25 = vadd.f32 %v1339_v24, %v1277_v18  ;;  %v1208_v26 = vadd.f32 %v1207_v20, %v2475_v34 }
 0x13c   : > { %2171 = shalt.err (!%p2168_p3)
}
 0x13d   : > { %s2172_s9 = scalar_lea.hbm %s2590_s29, 4096  ;;  %s2176_s13 = scalar_lea.hbm %s2792_s2, 8192 }
 0x13e   : > { %p2173_p4 = scmp.ne.s32.totalorder %s2590_s29, %s2172_s9  ;;  %p2177_p9 = scmp.lt.u32.totalorder %s2590_s29, %s2792_s2 }
 0x13f   : > { %p2178_p10 = scmp.lt.u32.totalorder %s2176_s13, %s2172_s9  ;;  %p2180_p12 = scmp.lt.u32.totalorder %s2172_s9, %s2590_s29 }
 0x140   : > { %p2174_p7 = pnand %p2173_p4, %p2352_p5 }
 0x141   : > { %p2179_p11 = por %p2178_p10, %p2177_p9 }
 0x142   : > { %p2175_p8 = pneg %p2174_p7 }
 0x143   : > { %p2181_p13 = por %p2180_p12, %p2179_p11 }
 0x145   : > { %p2182_p0 = pnand %p2181_p13, %p2175_p8 }
 0x147   : > { %2185 = shalt.err (!%p2182_p0)
}
 0x148   : > { %s2283_s27 = smov 64   ;;  %s2284_s28 = smov 4   ;;  %v1279_v27 = vmul.f32 %v2466_v23, %v2466_v23  ;;  %v1209_v34 = vadd.f32 %v2466_v23, %v1208_v26  ;;  %v1341_v30 = vadd.f32 %v1340_v25, %v1278_v29  ;;  %v1280_v31 = vmul.f32 %v2471_v28, %v2471_v28 }
 0x149   : > { %2072 = dma.vmem_to_hbm [thread:$0]  (%p2352_p5), %s2592_s23, 4096, %s2590_s29, %s1382_s30, %s2283_s27, %s2283_s27, %s2284_s28   ;;  %v1281_v35 = vmul.f32 %v2485_v51, %v2485_v51  ;;  %v1282_v42 = vmul.f32 %v2491_v58, %v2491_v58  ;;  %v1283_v23 = vmul.f32 %v2482_v47, %v2482_v47  ;;  %v1286_v60 = vmul.f32 %v2507_v22, %v2507_v22 }
 0x14a   : > { %v1342_v32 = vadd.f32 %v1341_v30, %v1279_v27  ;;  %v1210_v33 = vadd.f32 %v2471_v28, %v1209_v34  ;;  %v1284_v28 = vmul.f32 %v2487_v52, %v2487_v52  ;;  %v1290_v9 = vmul.f32 %v2523_v53, %v2523_v53  ;;  %s1559_s23 = sshll.u32 %s2442_s12, 3  ;;  %s1386_s29 = sand.u32 1, %s2333_s19  }
 0x14b   : > { %v1294_v25 = vmul.f32 %v2539_v21, %v2539_v21  ;;  %s1699_s30 = sshll.u32 %s2333_s19, 7  ;;  %s202_s5 = scalar_lea.vmem [#allocation4], %s1559_s23 }
 0x14c   : > { %v1211_v36 = vadd.f32 %v1210_v33, %v2485_v51  ;;  %v1343_v37 = vadd.f32 %v1342_v32, %v1280_v31  ;;  %v1285_v51 = vmul.f32 %v2501_v15, %v2501_v15  ;;  %v1298_v33 = vmul.f32 %v2557_v57, %v2557_v57  ;;  %s1421_s6 = sshll.u32 %s202_s5, 4  ;;  %s2707_s7 = scalar_lea.vmem [#allocation6], %s1559_s23  ;;  %s2715_s6 = int_to_ptr.vmem [resolvable:$true] %s1421_s6 }
 0x14d   : > { %s1434_s8 = sshll.u32 %s2707_s7, 4  ;;  %s2713_s10 = scalar_lea.hbm %s2793_s3, %s1699_s30  ;;  %s2722_s8 = int_to_ptr.vmem [resolvable:$true] %s1434_s8 }
 0x14e   : > { %v1344_v38 = vadd.f32 %v1343_v37, %v1281_v35  ;;  %v1212_v41 = vadd.f32 %v1211_v36, %v2491_v58  ;;  %s2720_s13 = scalar_lea.hbm %s2794_s4, %s1699_s30  ;;  %s2724_s14 = scalar_lea.sflag [#allocation5], %s1386_s29 }
 0x14f   : > { %s2186_s22 = scalar_lea.vmem %s2715_s6, 128  ;;  %s2285_s27 = smov [#allocation4]  }
 0x150   : > { %v1213_v45 = vadd.f32 %v2482_v47, %v1212_v41  ;;  %v1345_v48 = vadd.f32 %v1344_v38, %v1282_v42  ;;  %v1287_v47 = vmul.f32 %v2498_v11, %v2498_v11  ;;  %p2187_p1 = scmp.ne.s32.totalorder %s2715_s6, %s2186_s22  ;;  %s2190_s28 = sshll.u32 %s2285_s27, 4  ;;  %s2191_s28 = int_to_ptr.vmem [resolvable:$false] %s2190_s28 }
 0x151   : > { %s2192_s23 = scalar_lea.vmem %s2191_s28, 256  ;;  %p2193_p4 = scmp.lt.s32.totalorder %s2715_s6, %s2191_s28 }
 0x152   : > { %v1346_v50 = vadd.f32 %v1345_v48, %v1283_v23  ;;  %v1214_v54 = vadd.f32 %v2487_v52, %v1213_v45  ;;  %v1288_v52 = vmul.f32 %v2503_v16, %v2503_v16  ;;  %v1303_v45 = vmul.f32 %v2567_v2, %v2567_v2  ;;  %p2188_p2 = pnand %p2187_p1, %p2352_p5  ;;  %p2194_p7 = scmp.lt.s32.totalorder %s2192_s23, %s2186_s22 }
 0x154   : > { %v1215_v55 = vadd.f32 %v1214_v54, %v2501_v15  ;;  %v1347_v56 = vadd.f32 %v1346_v50, %v1284_v28  ;;  %v1289_v15 = vmul.f32 %v2517_v43, %v2517_v43  ;;  %v1304_v28 = vmul.f32 %v2578_v14, %v2578_v14  ;;  %p2189_p3 = pneg %p2188_p2  ;;  %p2195_p8 = por %p2194_p7, %p2193_p4 }
 0x156   : > { %v1348_v59 = vadd.f32 %v1347_v56, %v1285_v51  ;;  %v1216_v58 = vadd.f32 %v1215_v55, %v2507_v22  ;;  %v1374_v55 = vlaneseq  ;;  %p2196_p9 = pnand %p2195_p8, %p2189_p3 }
 0x158   : > { %v1217_v61 = vadd.f32 %v2498_v11, %v1216_v58  ;;  %v1349_v62 = vadd.f32 %v1348_v59, %v1286_v60  ;;  %v1291_v11 = vmul.f32 %v2514_v39, %v2514_v39  ;;  %v1375_v60 = vshrl.u32 %v1374_v55, 7 }
 0x15a   : > { %v1350_v0 = vadd.f32 %v1349_v62, %v1287_v47  ;;  %v1218_v1 = vadd.f32 %v2503_v16, %v1217_v61  ;;  %v1292_v16 = vmul.f32 %v2519_v44, %v2519_v44  ;;  %vm1376_vm2 = vcmp.eq.s32.totalorder %v1375_v60, 0 }
 0x15c   : > { %v1219_v5 = vadd.f32 %v1218_v1, %v2517_v43  ;;  %v1351_v7 = vadd.f32 %v1350_v0, %v1288_v52  ;;  %v1293_v43 = vmul.f32 %v2533_v12, %v2533_v12 }
 0x15e   : > { %v1352_v3 = vadd.f32 %v1351_v7, %v1289_v15  ;;  %v1220_v22 = vadd.f32 %v1219_v5, %v2523_v53 }
 0x160   : > { %v1221_v10 = vadd.f32 %v2514_v39, %v1220_v22  ;;  %v1353_v17 = vadd.f32 %v1352_v3, %v1290_v9  ;;  %v1295_v39 = vmul.f32 %v2530_v6, %v2530_v6 }
 0x162   : > { %v1354_v18 = vadd.f32 %v1353_v17, %v1291_v11  ;;  %v1222_v63 = vadd.f32 %v2519_v44, %v1221_v10  ;;  %v1296_v44 = vmul.f32 %v2535_v13, %v2535_v13 }
 0x164   : > { %v1223_v4 = vadd.f32 %v1222_v63, %v2533_v12  ;;  %v1355_v20 = vadd.f32 %v1354_v18, %v1292_v16  ;;  %v1297_v12 = vmul.f32 %v2549_v46, %v2549_v46 }
 0x166   : > { %v1356_v24 = vadd.f32 %v1355_v20, %v1293_v43  ;;  %v1224_v53 = vadd.f32 %v1223_v4, %v2539_v21 }
 0x168   : > { %v1225_v26 = vadd.f32 %v2530_v6, %v1224_v53  ;;  %v1357_v29 = vadd.f32 %v1356_v24, %v1294_v25  ;;  %v1299_v6 = vmul.f32 %v2546_v40, %v2546_v40 }
 0x16a   : > { %v1358_v27 = vadd.f32 %v1357_v29, %v1295_v39  ;;  %v1226_v34 = vadd.f32 %v2535_v13, %v1225_v26  ;;  %v1300_v13 = vmul.f32 %v2553_v49, %v2553_v49 }
 0x16c   : > { %v1227_v30 = vadd.f32 %v1226_v34, %v2549_v46  ;;  %v1359_v31 = vadd.f32 %v1358_v27, %v1296_v44  ;;  %v1301_v46 = vmul.f32 %v2574_v8, %v2574_v8 }
 0x16e   : > { %v1360_v32 = vadd.f32 %v1359_v31, %v1297_v12  ;;  %v1228_v21 = vadd.f32 %v1227_v30, %v2557_v57 }
 0x170   : > { %v1229_v35 = vadd.f32 %v2546_v40, %v1228_v21  ;;  %v1361_v36 = vadd.f32 %v1360_v32, %v1298_v33  ;;  %v1302_v40 = vmul.f32 %v2585_v19, %v2585_v19 }
 0x172   : > { %v1362_v37 = vadd.f32 %v1361_v36, %v1299_v6  ;;  %v1230_v38 = vadd.f32 %v2553_v49, %v1229_v35 }
 0x174   : > { %v1231_v41 = vadd.f32 %v1230_v38, %v2574_v8  ;;  %v1363_v42 = vadd.f32 %v1362_v37, %v1300_v13 }
 0x176   : > { %v1364_v57 = vadd.f32 %v1363_v42, %v1301_v46  ;;  %v1232_v23 = vadd.f32 %v1231_v41, %v2585_v19 }
 0x178   : > { %v1233_v48 = vadd.f32 %v2567_v2, %v1232_v23  ;;  %v1365_v49 = vadd.f32 %v1364_v57, %v1302_v40 }
 0x17a   : > { %v1234_v8 = vadd.f32 %v2578_v14, %v1233_v48  ;;  %v1366_v50 = vadd.f32 %v1365_v49, %v1303_v45 }
 0x17c   : > { %v1235_v54 = vrot.slane %v1234_v8, 4  ;;  %v1367_v51 = vadd.f32 %v1366_v50, %v1304_v28 }
 0x17e   : > { %v1236_v56 = vadd.f32 %v1235_v54, %v1234_v8  ;;  %v1368_v59 = vrot.slane %v1367_v51, 4 }
 0x180   : > { %v1237_v19 = vrot.slane %v1236_v56, 2  ;;  %v1369_v58 = vadd.f32 %v1368_v59, %v1367_v51 }
 0x182   : > { %v1370_v47 = vrot.slane %v1369_v58, 2  ;;  %v1238_v2 = vadd.f32 %v1237_v19, %v1236_v56 }
 0x184   : > { %v1239_v61 = vrot.slane %v1238_v2, 1  ;;  %v1371_v62 = vadd.f32 %v1370_v47, %v1369_v58 }
 0x186   : > { %v1240_v14 = vadd.f32 %v1239_v61, %v1238_v2  ;;  %v1372_v52 = vrot.slane %v1371_v62, 1 }
 0x188   : > { %v1373_v0 = vadd.f32 %v1372_v52, %v1371_v62  ;;  %v1377_v1 = vsel %vm1376_vm2, %v1240_v14, 0.0 }
 0x189   : > { %1378 = vst [vmem:[%s202_s5] sm:$0xff] %v1377_v1 }
 0x18a   : > { %v1379_v15 = vsel %vm1376_vm2, %v1373_v0, 0.0 }
 0x18b   : > { %2199 = shalt.err (!%p2196_p9)
}
 0x18c   : > { %s2200_s29 = scalar_lea.hbm %s2713_s10, 128  ;;  %s2204_s12 = scalar_lea.hbm %s2793_s3, 256 }
 0x18d   : > { %p2201_p10 = scmp.ne.s32.totalorder %s2713_s10, %s2200_s29  ;;  %p2205_p13 = scmp.lt.u32.totalorder %s2713_s10, %s2793_s3 }
 0x18e   : > { %p2206_p0 = scmp.lt.u32.totalorder %s2204_s12, %s2200_s29  ;;  %p2208_p2 = scmp.lt.u32.totalorder %s2200_s29, %s2713_s10 }
 0x18f   : > { %p2202_p11 = pnand %p2201_p10, %p2352_p5 }
 0x190   : > { %p2207_p1 = por %p2206_p0, %p2205_p13 }
 0x191   : > { %p2203_p12 = pneg %p2202_p11 }
 0x192   : > { %p2209_p3 = por %p2208_p2, %p2207_p1 }
 0x194   : > { %p2210_p4 = pnand %p2209_p3, %p2203_p12 }
 0x196   : > { %2213 = shalt.err (!%p2210_p4)
}
 0x197   : > { %2073 = dma.vmem_to_hbm [thread:$0]  (%p2352_p5), %s2715_s6, 128, %s2713_s10, %s2724_s14   ;;  %1380 = vst [vmem:[%s2707_s7] sm:$0xff] %v1379_v15 }
 0x198   : > { %s2214_s11 = scalar_lea.vmem %s2722_s8, 128  ;;  %s2286_s22 = smov [#allocation6]  }
 0x199   : > { %p2215_p7 = scmp.ne.s32.totalorder %s2722_s8, %s2214_s11  ;;  %s2218_s27 = sshll.u32 %s2286_s22, 4  ;;  %s2219_s27 = int_to_ptr.vmem [resolvable:$false] %s2218_s27 }
 0x19a   : > { %s2220_s28 = scalar_lea.vmem %s2219_s27, 256  ;;  %p2221_p10 = scmp.lt.s32.totalorder %s2722_s8, %s2219_s27 }
 0x19b   : > { %p2216_p8 = pnand %p2215_p7, %p2352_p5  ;;  %p2222_p11 = scmp.lt.s32.totalorder %s2220_s28, %s2214_s11 }
 0x19d   : > { %p2217_p9 = pneg %p2216_p8  ;;  %p2223_p12 = por %p2222_p11, %p2221_p10 }
 0x19f   : > { %p2224_p13 = pnand %p2223_p12, %p2217_p9 }
 0x1a1   : > { %2227 = shalt.err (!%p2224_p13)
}
 0x1a2   : > { %s2228_s6 = scalar_lea.hbm %s2720_s13, 128  ;;  %s2232_s23 = scalar_lea.hbm %s2794_s4, 256 }
 0x1a3   : > { %p2229_p0 = scmp.ne.s32.totalorder %s2720_s13, %s2228_s6  ;;  %p2233_p3 = scmp.lt.u32.totalorder %s2720_s13, %s2794_s4 }
 0x1a4   : > { %p2234_p4 = scmp.lt.u32.totalorder %s2232_s23, %s2228_s6  ;;  %p2236_p8 = scmp.lt.u32.totalorder %s2228_s6, %s2720_s13 }
 0x1a5   : > { %p2230_p1 = pnand %p2229_p0, %p2352_p5 }
 0x1a6   : > { %p2235_p7 = por %p2234_p4, %p2233_p3 }
 0x1a7   : > { %p2231_p2 = pneg %p2230_p1 }
 0x1a8   : > { %p2237_p9 = por %p2236_p8, %p2235_p7 }
 0x1aa   : > { %p2238_p10 = pnand %p2237_p9, %p2231_p2 }
 0x1ac   : > { %2241 = shalt.err (!%p2238_p10)
}
 0x1ad   : > { %2074 = dma.vmem_to_hbm [thread:$0]  (%p2352_p5), %s2722_s8, 128, %s2720_s13, %s2724_s14  }
 0x1ae PF: > { %p2088_p11 = scmp.ge.s32.totalorder %s2280_s18, 2  ;;  %s1446_s5 = sand.u32 1, %s2268_s15  }
 0x1af   : > { %s1447_s12 = scalar_lea.sflag [#allocation3], %s1446_s5 }
 0x1b0   : > { %p2079_p12 = pnand %p2088_p11, %p2356_p6 }
 0x1b2   : > { %2259 = dma.done.wait (!%p2079_p12), %s1447_s12, 4096  }
 0x1b3   : > { %2261 = vsyncadd (!%p2079_p12), %s1447_s12, 4294963200  ;;  %s1455_s9 = sand.u32 1, %s1554_s20  }
 0x1b4   : > { %s1456_s19 = scalar_lea.sflag [#allocation5], %s1455_s9 }
 0x1b5   : > { %2263 = dma.done.wait (!%p2079_p12), %s1456_s19, 256  }
 0x1b6   : > { %2265 = vsyncadd (!%p2079_p12), %s1456_s19, 4294967040  ;;  %p18_p5 = scmp.ge.s32.totalorder %s2337_s21, 4   ;;  %s2797_s15 = smov %s2272_s16 }
 0x1b7   : > { %s2798_s16 = smov %s2276_s17  ;;  %s2799_s17 = smov %s2350_s24 }
 0x1b8   : > { %s2800_s18 = smov %s2337_s21  ;;  %20 = sbr.rel (!%p18_p5) target bundleno = 5 (0x5), region = 95 }
 0x1bf   :  { %1470 = vsyncpa [#allocation3], 1 }
 0x1c0   :  { %1472 = vsyncpa [#allocation3 + $0x1], 1 }
 0x1c1   :  { %1473 = vsyncpa [#allocation5], 1 }
 0x1c2   :  { %1475 = vsyncpa [#allocation5 + $0x1], 1 }

</bundles_post_ra>
